<compile_context>
chip_gen: v5e
topology: v5e:2x2
jax: 0.10.0
libtpu: 0.0.40
codegen_flags: <defaults>
</compile_context>

<pallas_src>
import functools

import jax
import jax.numpy as jnp
from jax.experimental import pallas as pl
from jax.experimental.pallas import tpu as pltpu


def _round_up(x: int, m: int) -> int:
    return ((x + m - 1) // m) * m


def _default_gate_dtype():
    # bf16 EUP/VPU exists on v6e / v7x; v5e (and older) has no bf16 vector math.
    try:
        kind = jax.devices()[0].device_kind.lower()
    except Exception:
        return jnp.float32
    return jnp.bfloat16 if ("v6" in kind or "v7" in kind) else jnp.float32


def _frnn_kernel(x_ref, wih_ref, bias_ref, bhn_ref, whead_ref, bhead_ref,
                 out_ref, *, hidden, gate_dtype):
    H = hidden
    # x ships as f32 (no extra wrapper cast pass over HBM); cast here for the MXU.
    x = x_ref[...].astype(wih_ref.dtype)                       # (TB, K) bf16

    def gate(g):
        # (TB, K) @ (K, H) on the MXU, f32 accumulate, + folded bias row.
        return (jnp.dot(x, wih_ref[:, g * H:(g + 1) * H],
                        preferred_element_type=jnp.float32)
                + bias_ref[:, g * H:(g + 1) * H])

    # PyTorch GRU gate order [r, z, n]. The z block of W_ih / bias was negated in
    # the wrapper, so sigmoid gives (1 - z) directly. Per-gate processing keeps the
    # live f32 temp at (TB, H) instead of a spilled (TB, 3H) array.
    r = jax.nn.sigmoid(gate(0).astype(gate_dtype))              # r
    s = jax.nn.sigmoid(gate(1).astype(gate_dtype))              # 1 - z
    n_pre = gate(2) + r.astype(jnp.float32) * bhn_ref[...]
    n = jnp.tanh(n_pre.astype(gate_dtype))

    # h0 = 0  =>  h' = (1 - z) * n
    h = s * n                                                   # (TB, H)

    # Linear head on the MXU; lane-dense 128-wide padded output, bf16 store.
    out = (jnp.dot(h.astype(whead_ref.dtype), whead_ref[...],
                   preferred_element_type=jnp.float32)
           + bhead_ref[...])
    out_ref[...] = out.astype(out_ref.dtype)


def dummy_frnn_forward(x, params, *, batch_tile=2048, gate_dtype=None):
    """x: (B, input_size). Returns (B, n_out) float32."""
    w_ih, b_ih, b_hh, w_head, b_head = (
        params["w_ih"], params["b_ih"], params["b_hh"],
        params["w_head"], params["b_head"])
    if x.dtype != jnp.float32:        # mirror PyTorch's x.to(head.weight.dtype)
        x = x.astype(jnp.float32)
    B, input_size = x.shape
    n_out, hidden = w_head.shape
    H = hidden
    assert H % 128 == 0, "hidden must be a multiple of 128 (lane-aligned gate slices)"

    mxu_dtype = jnp.bfloat16
    if gate_dtype is None:
        gate_dtype = _default_gate_dtype()

    # ---- constant folds / layout plumbing (weights only, never per-row x) ----
    # W_ih^T with the z column block negated: sigmoid(-a) = 1 - sigmoid(a).
    wih_t = w_ih.T
    wih_t = wih_t.at[:, H:2 * H].multiply(-1.0)
    wih_t = wih_t.astype(mxu_dtype)                                    # (K, 3H)
    # Fold b_hr/b_hz into the input bias and negate the z slot; keep b_hn separate
    # (it is multiplied by r inside the n gate).
    bias_row = jnp.concatenate([
        b_ih[:H] + b_hh[:H],                     # r
        -(b_ih[H:2 * H] + b_hh[H:2 * H]),        # z (negated -> 1 - z)
        b_ih[2 * H:3 * H],                       # n (input part only)
    ]).reshape(1, 3 * H).astype(jnp.float32)
    bhn_row = b_hh[2 * H:].reshape(1, H).astype(jnp.float32)           # (1, H)
    # Lane-dense head: pad output lanes up to a multiple of 128 (unmasked vst).
    n_pad = _round_up(max(n_out, 128), 128)
    whead_t = (jnp.zeros((H, n_pad), jnp.float32)
               .at[:, :n_out].set(w_head.T).astype(mxu_dtype))          # (H, n_pad)
    bhead_row = jnp.zeros((1, n_pad), jnp.float32).at[0, :n_out].set(b_head)

    # ---- batch tiling (parallel grid axis, partial last block allowed) ------
    batch_tile = max(16, _round_up(batch_tile, 16))
    # Aim for >= 2 grid steps on large B (v7x megacore); 16-row multiples keep
    # the bf16 output block sublane-tile aligned even for partial last blocks.
    tb = min(batch_tile, _round_up(pl.cdiv(B, 2), 16))
    if tb >= B:
        tb = B                                   # single exact block, no masking
    grid = (pl.cdiv(B, tb),)

    kernel = functools.partial(_frnn_kernel, hidden=H, gate_dtype=gate_dtype)

    cost = pl.CostEstimate(
        flops=2 * B * input_size * 3 * H + 2 * B * H * n_pad + 8 * B * H,
        transcendentals=3 * B * H,
        bytes_accessed=(B * input_size * 4 + B * n_pad * 2
                        + wih_t.size * 2 + whead_t.size * 2
                        + (4 * H + n_pad) * 4),
    )

    out_padded = pl.pallas_call(
        kernel,
        out_shape=jax.ShapeDtypeStruct((B, n_pad), jnp.bfloat16),
        grid=grid,
        in_specs=[
            pl.BlockSpec((tb, input_size), lambda i: (i, 0)),        # x tile (f32)
            pl.BlockSpec((input_size, 3 * H), lambda i: (0, 0)),     # W_ih^T (z negated)
            pl.BlockSpec((1, 3 * H), lambda i: (0, 0)),              # folded bias
            pl.BlockSpec((1, H), lambda i: (0, 0)),                  # b_hn
            pl.BlockSpec((H, n_pad), lambda i: (0, 0)),              # W_head^T (padded)
            pl.BlockSpec((1, n_pad), lambda i: (0, 0)),              # b_head (padded)
        ],
        out_specs=pl.BlockSpec((tb, n_pad), lambda i: (i, 0)),
        compiler_params=pltpu.CompilerParams(
            dimension_semantics=("parallel",),
            vmem_limit_bytes=32 * 1024 * 1024),
        cost_estimate=cost,
    )(x, wih_t, bias_row, bhn_row, whead_t, bhead_row)

    return out_padded[:, :n_out].astype(jnp.float32)


def _init_params(key, input_size, hidden, n_out):
    """Deterministic synthetic init (PyTorch-style uniform(-1/sqrt(H), 1/sqrt(H)))."""
    k = 1.0 / jnp.sqrt(jnp.float32(hidden))
    keys = jax.random.split(key, 6)
    u = lambda kk, shape: jax.random.uniform(kk, shape, jnp.float32, -k, k)
    return {
        "w_ih":   u(keys[0], (3 * hidden, input_size)),  # weight_ih_l0
        "b_ih":   u(keys[1], (3 * hidden,)),             # bias_ih_l0
        "b_hh":   u(keys[2], (3 * hidden,)),             # bias_hh_l0
        # weight_hh_l0 is unused because h0 == 0 (only its bias matters).
        "w_head": u(keys[3], (n_out, hidden)),           # head.weight
        "b_head": u(keys[4], (n_out,)),                  # head.bias
    }


def _reference(x, params):
    """Pure-JAX f32 reference of the PyTorch forward."""
    H = params["w_head"].shape[1]
    g = x @ params["w_ih"].T + params["b_ih"]
    bhh = params["b_hh"]
    r = jax.nn.sigmoid(g[:, :H] + bhh[:H])
    z = jax.nn.sigmoid(g[:, H:2 * H] + bhh[H:2 * H])
    n = jnp.tanh(g[:, 2 * H:] + r * bhh[2 * H:])
    h = (1.0 - z) * n
    return h @ params["w_head"].T + params["b_head"]


if __name__ == "__main__":
    B, input_size, hidden, n_out = 8, 32, 128, 3

    key = jax.random.PRNGKey(0)
    kx, kp = jax.random.split(key)
    x = jax.random.normal(kx, (B, input_size), jnp.float32)
    params = _init_params(kp, input_size, hidden, n_out)

    out = dummy_frnn_forward(x, params)
    out = jax.block_until_ready(out)

    ref = _reference(x, params)
    assert out.shape == (B, n_out)
    # bf16 MXU inputs / bf16 output store (f32 accumulate) -> relaxed tolerance.
    assert jnp.allclose(out, ref, atol=3e-2, rtol=3e-2), (
        f"max abs err {jnp.max(jnp.abs(out - ref))}")

    print("KERNEL_OK")
</pallas_src>

<mosaic_0001>
module attributes {stable_mosaic.version = 11 : i64} {
  func.func @_frnn_kernel(%arg0: i32, %arg1: memref<8x32xf32, #tpu.memory_space<vmem>>, %arg2: memref<32x384xbf16, #tpu.memory_space<vmem>>, %arg3: memref<1x384xf32, #tpu.memory_space<vmem>>, %arg4: memref<1x128xf32, #tpu.memory_space<vmem>>, %arg5: memref<128x128xbf16, #tpu.memory_space<vmem>>, %arg6: memref<1x128xf32, #tpu.memory_space<vmem>>, %arg7: memref<8x128xbf16, #tpu.memory_space<vmem>>) attributes {dimension_semantics = [#tpu.dimension_semantics<parallel>], iteration_bounds = array<i64: 1>, scalar_prefetch = 0 : i64, scratch_operands = 0 : i64, tpu.core_type = #tpu.core_type<tc>, window_params = [{transform_indices = @transform_0, window_bounds = array<i64: 8, 32>}, {pipeline_mode = #tpu.pipeline_mode<synchronous>, transform_indices = @transform_1, window_bounds = array<i64: 32, 384>}, {pipeline_mode = #tpu.pipeline_mode<synchronous>, transform_indices = @transform_2, window_bounds = array<i64: 1, 384>}, {pipeline_mode = #tpu.pipeline_mode<synchronous>, transform_indices = @transform_3, window_bounds = array<i64: 1, 128>}, {pipeline_mode = #tpu.pipeline_mode<synchronous>, transform_indices = @transform_4, window_bounds = array<i64: 128, 128>}, {pipeline_mode = #tpu.pipeline_mode<synchronous>, transform_indices = @transform_5, window_bounds = array<i64: 1, 128>}, {transform_indices = @transform_6, window_bounds = array<i64: 8, 128>}]} {
    %c0 = arith.constant 0 : index
    %c0_0 = arith.constant 0 : index
    %0 = vector.load %arg1[%c0, %c0_0] : memref<8x32xf32, #tpu.memory_space<vmem>>, vector<8x32xf32>
    %1 = arith.truncf %0 : vector<8x32xf32> to vector<8x32xbf16>
    %c0_1 = arith.constant 0 : index
    %c0_2 = arith.constant 0 : index
    %2 = vector.load %arg2[%c0_1, %c0_2] : memref<32x384xbf16, #tpu.memory_space<vmem>>, vector<32x128xbf16>
    %cst = arith.constant dense<0.000000e+00> : vector<8x128xf32>
    %3 = tpu.matmul %1, %2, %cst {dimension_numbers = #tpu.dot_dimension_numbers<[1], [0], [0], [1], [0, 0, 1, 1], [], []>} : vector<8x32xbf16>, vector<32x128xbf16>, vector<8x128xf32> -> vector<8x128xf32>
    %c0_3 = arith.constant 0 : index
    %c0_4 = arith.constant 0 : index
    %4 = vector.load %arg3[%c0_3, %c0_4] : memref<1x384xf32, #tpu.memory_space<vmem>>, vector<1x128xf32>
    %5 = vector.broadcast %4 : vector<1x128xf32> to vector<8x128xf32>
    %6 = arith.addf %3, %5 : vector<8x128xf32>
    %7 = arith.negf %6 : vector<8x128xf32>
    %8 = math.exp %7 : vector<8x128xf32>
    %cst_5 = arith.constant 1.000000e+00 : f32
    %9 = vector.broadcast %cst_5 : f32 to vector<8x128xf32>
    %10 = arith.addf %9, %8 : vector<8x128xf32>
    %11 = arith.divf %9, %10 : vector<8x128xf32>
    %c0_6 = arith.constant 0 : index
    %c128 = arith.constant 128 : index
    %12 = vector.load %arg2[%c0_6, %c128] : memref<32x384xbf16, #tpu.memory_space<vmem>>, vector<32x128xbf16>
    %cst_7 = arith.constant dense<0.000000e+00> : vector<8x128xf32>
    %13 = tpu.matmul %1, %12, %cst_7 {dimension_numbers = #tpu.dot_dimension_numbers<[1], [0], [0], [1], [0, 0, 1, 1], [], []>} : vector<8x32xbf16>, vector<32x128xbf16>, vector<8x128xf32> -> vector<8x128xf32>
    %c0_8 = arith.constant 0 : index
    %c128_9 = arith.constant 128 : index
    %14 = vector.load %arg3[%c0_8, %c128_9] : memref<1x384xf32, #tpu.memory_space<vmem>>, vector<1x128xf32>
    %15 = vector.broadcast %14 : vector<1x128xf32> to vector<8x128xf32>
    %16 = arith.addf %13, %15 : vector<8x128xf32>
    %17 = arith.negf %16 : vector<8x128xf32>
    %18 = math.exp %17 : vector<8x128xf32>
    %cst_10 = arith.constant 1.000000e+00 : f32
    %19 = vector.broadcast %cst_10 : f32 to vector<8x128xf32>
    %20 = arith.addf %19, %18 : vector<8x128xf32>
    %21 = arith.divf %19, %20 : vector<8x128xf32>
    %c0_11 = arith.constant 0 : index
    %c256 = arith.constant 256 : index
    %22 = vector.load %arg2[%c0_11, %c256] : memref<32x384xbf16, #tpu.memory_space<vmem>>, vector<32x128xbf16>
    %cst_12 = arith.constant dense<0.000000e+00> : vector<8x128xf32>
    %23 = tpu.matmul %1, %22, %cst_12 {dimension_numbers = #tpu.dot_dimension_numbers<[1], [0], [0], [1], [0, 0, 1, 1], [], []>} : vector<8x32xbf16>, vector<32x128xbf16>, vector<8x128xf32> -> vector<8x128xf32>
    %c0_13 = arith.constant 0 : index
    %c256_14 = arith.constant 256 : index
    %24 = vector.load %arg3[%c0_13, %c256_14] : memref<1x384xf32, #tpu.memory_space<vmem>>, vector<1x128xf32>
    %25 = vector.broadcast %24 : vector<1x128xf32> to vector<8x128xf32>
    %26 = arith.addf %23, %25 : vector<8x128xf32>
    %c0_15 = arith.constant 0 : index
    %c0_16 = arith.constant 0 : index
    %27 = vector.load %arg4[%c0_15, %c0_16] : memref<1x128xf32, #tpu.memory_space<vmem>>, vector<1x128xf32>
    %28 = vector.broadcast %27 : vector<1x128xf32> to vector<8x128xf32>
    %29 = arith.mulf %11, %28 : vector<8x128xf32>
    %30 = arith.addf %26, %29 : vector<8x128xf32>
    %31 = math.tanh %30 : vector<8x128xf32>
    %32 = arith.mulf %21, %31 : vector<8x128xf32>
    %33 = arith.truncf %32 : vector<8x128xf32> to vector<8x128xbf16>
    %c0_17 = arith.constant 0 : index
    %c0_18 = arith.constant 0 : index
    %34 = vector.load %arg5[%c0_17, %c0_18] : memref<128x128xbf16, #tpu.memory_space<vmem>>, vector<128x128xbf16>
    %cst_19 = arith.constant dense<0.000000e+00> : vector<8x128xf32>
    %35 = tpu.matmul %33, %34, %cst_19 {dimension_numbers = #tpu.dot_dimension_numbers<[1], [0], [0], [1], [0, 0, 1, 1], [], []>} : vector<8x128xbf16>, vector<128x128xbf16>, vector<8x128xf32> -> vector<8x128xf32>
    %c0_20 = arith.constant 0 : index
    %c0_21 = arith.constant 0 : index
    %36 = vector.load %arg6[%c0_20, %c0_21] : memref<1x128xf32, #tpu.memory_space<vmem>>, vector<1x128xf32>
    %37 = vector.broadcast %36 : vector<1x128xf32> to vector<8x128xf32>
    %38 = arith.addf %35, %37 : vector<8x128xf32>
    %39 = arith.truncf %38 : vector<8x128xf32> to vector<8x128xbf16>
    %c0_22 = arith.constant 0 : index
    %c0_23 = arith.constant 0 : index
    %40 = vector.load %arg7[%c0_22, %c0_23] : memref<8x128xbf16, #tpu.memory_space<vmem>>, vector<8x128xbf16>
    tpu.vector_store %arg7[%c0_22, %c0_23], %39 {strides = array<i32>} : memref<8x128xbf16, #tpu.memory_space<vmem>>, vector<8x128xbf16>,
    return
  }
  func.func @transform_0(%arg0: i32) -> (i32, i32) {
    %c0_i32 = arith.constant 0 : i32
    %c0_i32_0 = arith.constant 0 : i32
    return %arg0, %c0_i32 : i32, i32
  }
  func.func @transform_1(%arg0: i32) -> (i32, i32) {
    %c0_i32 = arith.constant 0 : i32
    %c0_i32_0 = arith.constant 0 : i32
    %c0_i32_1 = arith.constant 0 : i32
    return %c0_i32, %c0_i32_0 : i32, i32
  }
  func.func @transform_2(%arg0: i32) -> (i32, i32) {
    %c0_i32 = arith.constant 0 : i32
    %c0_i32_0 = arith.constant 0 : i32
    %c0_i32_1 = arith.constant 0 : i32
    return %c0_i32, %c0_i32_0 : i32, i32
  }
  func.func @transform_3(%arg0: i32) -> (i32, i32) {
    %c0_i32 = arith.constant 0 : i32
    %c0_i32_0 = arith.constant 0 : i32
    %c0_i32_1 = arith.constant 0 : i32
    return %c0_i32, %c0_i32_0 : i32, i32
  }
  func.func @transform_4(%arg0: i32) -> (i32, i32) {
    %c0_i32 = arith.constant 0 : i32
    %c0_i32_0 = arith.constant 0 : i32
    %c0_i32_1 = arith.constant 0 : i32
    return %c0_i32, %c0_i32_0 : i32, i32
  }
  func.func @transform_5(%arg0: i32) -> (i32, i32) {
    %c0_i32 = arith.constant 0 : i32
    %c0_i32_0 = arith.constant 0 : i32
    %c0_i32_1 = arith.constant 0 : i32
    return %c0_i32, %c0_i32_0 : i32, i32
  }
  func.func @transform_6(%arg0: i32) -> (i32, i32) {
    %c0_i32 = arith.constant 0 : i32
    %c0_i32_0 = arith.constant 0 : i32
    return %arg0, %c0_i32 : i32, i32
  }
}

</mosaic_0001>

<bundles_post_ra>
// kernel: tpu_custom_call.1
= control target key start
LH: loop header
LB: loop body
LE: loop exit
PB: predicated region body
PF: predicated region fallthrough
CT: control target
= control target key end

     0   :  { %11 = vsyncpa [#allocation3], 0  ;;  %s630_s0 = inlined_call_operand.hbm [shape: f32[8,32], index: 0, kind: input, shape index: {}]   ;;  %s631_s1 = inlined_call_operand.hbm [shape: bf16[32,384], index: 1, kind: input, shape index: {}]   ;;  %s632_s2 = inlined_call_operand.hbm [shape: f32[1,384], index: 2, kind: input, shape index: {}]   ;;  %s633_s3 = inlined_call_operand.vmem [shape: f32[1,128], index: 3, kind: input, shape index: {}]   ;;  %s634_s4 = inlined_call_operand.hbm [shape: bf16[128,128], index: 4, kind: input, shape index: {}]   ;;  %s635_s5 = inlined_call_operand.vmem [shape: f32[1,128], index: 5, kind: input, shape index: {}]   ;;  %s636_s6 = inlined_call_operand.hbm [shape: bf16[8,128], index: 6, kind: output, shape index: {}]  }
   0x1   :  { %12 = vsyncpa [#allocation6], 0 }
   0x2   :  { %13 = vsyncpa [#allocation9], 0  ;;  %s30_s23 = sshll.u32 %s631_s1, 4  ;;  %s31_s23 = int_to_ptr.hbm [resolvable:$true] %s30_s23 }
   0x3   :  { %14 = vsyncpa [#allocation4], 0  ;;  %s565_s24 = smov [#allocation5]   ;;  %s20_s28 = sshll.u32 %s630_s0, 4  ;;  %s21_s28 = int_to_ptr.hbm [resolvable:$true] %s20_s28 }
   0x4   :  { %s32_s25 = sshll.u32 %s565_s24, 4  ;;  %s566_s29 = smov 192   ;;  %s33_s25 = int_to_ptr.vmem [resolvable:$true] %s32_s25 }
   0x5   :  { %s567_s30 = smov 12   ;;  %s568_s7 = smov [#allocation2]  }
   0x6   :  { %38 = dma.hbm_to_vmem [thread:$0]  %s31_s23, 768, %s33_s25, [#allocation6], %s566_s29, %s566_s29, %s567_s30  }
   0x7   :  { %s22_s8 = sshll.u32 %s568_s7, 4  ;;  %s44_s11 = sshll.u32 %s632_s2, 4  ;;  %s23_s8 = int_to_ptr.vmem [resolvable:$true] %s22_s8  ;;  %s45_s11 = int_to_ptr.hbm [resolvable:$true] %s44_s11 }
   0x8   :  { %25 = dma.hbm_to_vmem [thread:$0]  %s21_s28, 128, %s23_s8, [#allocation3]  }
   0x9   :  { %s56_s13 = sshll.u32 %s634_s4, 4  ;;  %s569_s14 = smov [#allocation7]   ;;  %s57_s13 = int_to_ptr.hbm [resolvable:$true] %s56_s13 }
   0xa   :  { %s46_s15 = sshll.u32 %s569_s14, 4  ;;  %s570_s0 = smov [#allocation8]   ;;  %s47_s15 = int_to_ptr.vmem [resolvable:$true] %s46_s15 }
   0xb   :  { %49 = dma.hbm_to_vmem [thread:$0]  %s45_s11, 48, %s47_s15, [#allocation6]  }
   0xc   :  { %s58_s16 = sshll.u32 %s570_s0, 4  ;;  %s571_s17 = smov 64   ;;  %s59_s16 = int_to_ptr.vmem [resolvable:$true] %s58_s16 }
   0xd   :  { %s572_s18 = smov 4  }
   0xe   :  { %64 = dma.hbm_to_vmem [thread:$0]  %s57_s13, 1024, %s59_s16, [#allocation9], %s571_s17, %s571_s17, %s572_s18  }
   0xf   :  { %557 = dma.done.wait [#allocation3], 128  }
  0x10   :  { %558 = vsyncadd [#allocation3], 4294967168 }
  0x11   :  { %559 = dma.done.wait [#allocation6], 816  }
  0x12   :  { %560 = vsyncadd [#allocation6], 4294966480 }
  0x13   :  { %561 = dma.done.wait [#allocation9], 1024  }
  0x14   :  { %562 = vsyncadd [#allocation9], 4294966272  ;;  %v344_v0 = vld [vmem:[#allocation5 + $0x18] sm:$0xf]  ;;  %v400_v1 = vld [vmem:[#allocation5 + $0x20] sm:$0xf0] }
  0x15   :  { %v354_v2 = vld [vmem:[#allocation5 + $0x1c] sm:$0xf]  ;;  %v345_v3 = vor.u32 %v400_v1, %v344_v0  ;;  %v402_v4 = vld [vmem:[#allocation5 + $0x24] sm:$0xf0]  ;;  %v340_v5 = vld [vmem:[#allocation5] sm:$0xf] }
  0x16   :  { %v399_v6 = vld [vmem:[#allocation5 + $0x8] sm:$0xf0]  ;;  %v355_v7 = vor.u32 %v402_v4, %v354_v2  ;;  %v350_v8 = vld [vmem:[#allocation5 + $0x4] sm:$0xf]  ;;  %v401_v9 = vld [vmem:[#allocation5 + $0xc] sm:$0xf0] }
  0x17   :  { %v84_v10 = vld [vmem:[#allocation2] sm:$0xff]  ;;  %116 = vmatpush.bf16.msra.mxu0 %v345_v3  ;;  %v341_v11 = vor.u32 %v399_v6, %v340_v5  ;;  %v364_v12 = vld [vmem:[#allocation5 + $0x20] sm:$0xf]  ;;  %v404_v13 = vld [vmem:[#allocation5 + $0x28] sm:$0xf0]  ;;  %v351_v15 = vor.u32 %v401_v9, %v350_v8  ;;  %vm106_vm0 = vcmask 261120  }
  0x18   :  { %v360_v14 = vld [vmem:[#allocation5 + $0x8] sm:$0xf]  ;;  %168 = vmatpush.bf16.msra.mxu1 %v355_v7  ;;  %v365_v16 = vor.u32 %v404_v13, %v364_v12  ;;  %v403_v17 = vld [vmem:[#allocation5 + $0x10] sm:$0xf0]  ;;  %v85_v18 = vpack.c.bf16 %v84_v10, %v84_v10  ;;  %v412_v20 = vld [vmem:[#allocation8 + $0x38] sm:$0xff]  ;;  %s573_s20 = smov [#allocation10]  }
  0x19   :  { %v361_v19 = vor.u32 %v403_v17, %v360_v14  ;;  %304 = vmatpush.bf16.msra.mxu3 %v412_v20  ;;  %v411_v21 = vld [vmem:[#allocation8 + $0x30] sm:$0xff]  ;;  %v410_v22 = vld [vmem:[#allocation8 + $0x28] sm:$0xff]  ;;  %v409_v23 = vld [vmem:[#allocation8 + $0x20] sm:$0xff]  ;;  %s324_s21 = sshll.u32 %s573_s20, 4  ;;  %s326_s24 = sshll.u32 %s636_s6, 4  ;;  %s325_s21 = int_to_ptr.vmem [resolvable:$true] %s324_s21  ;;  %s327_s24 = int_to_ptr.hbm [resolvable:$true] %s326_s24 }
  0x1a   :  { %220 = vmatpush.bf16.msra.mxu2 %v365_v16  ;;  %v422_v24 = vld [vmem:[#allocation7] ss:$0 sm:$0xff]  ;;  %v423_v25 = vld [vmem:[#allocation7 + $0x1] ss:$0 sm:$0xff]  ;;  %v407_v31 = vld [vmem:[#allocation8 + $0x10] sm:$0xff] }
  0x1b   :  { %117 = vmatpush.bf16.msra.mxu0 %v341_v11  ;;  %v408_v26 = vld [vmem:[#allocation8 + $0x18] sm:$0xff]  ;;  %v406_v34 = vld [vmem:[#allocation8 + $0x8] sm:$0xff]  ;;  %v405_v36 = vld [vmem:[#allocation8] sm:$0xff] }
  0x1c   :  { %169 = vmatpush.bf16.msra.mxu1 %v351_v15  ;;  %v424_v52 = vld [vmem:[#allocation7 + $0x2] ss:$0 sm:$0xff]  ;;  %v425_v55 = vld [vmem:[%s633_s3] ss:$0 sm:$0xff] }
  0x1d   :  { %305 = vmatpush.bf16.msra.mxu3 %v411_v21  ;;  %v426_v8 = vld [vmem:[%s635_s5] ss:$0 sm:$0xff] }
  0x1e   :  { %346 = vmatmul.msk.bf16.vlgmr.msra.gmra.mxu0 %vm106_vm0, %v85_v18  ;;  %221 = vmatpush.bf16.msra.mxu2 %v361_v19 }
  0x1f   :  { %356 = vmatmul.msk.bf16.vlgmr.msra.gmra.mxu1 %vm106_vm0, %v85_v18 }
  0x21   :  { %366 = vmatmul.msk.bf16.vlgmr.msra.gmra.mxu2 %vm106_vm0, %v85_v18  ;;  %306 = vmatpush.bf16.msra.mxu3 %v410_v22 }
  0x25   :  { %307 = vmatpush.bf16.msra.mxu3 %v409_v23 }
  0x29   :  { %308 = vmatpush.bf16.msra.mxu3 %v408_v26 }
  0x2d   :  { %309 = vmatpush.bf16.msra.mxu3 %v407_v31 }
  0x31   :  { %310 = vmatpush.bf16.msra.mxu3 %v406_v34 }
  0x35   :  { %311 = vmatpush.bf16.msra.mxu3 %v405_v36 }
  0x9b   :  { %v119_v27 = vpop.f32.mrf.mxu0 }
  0x9c   :  { %v120_v28 = vadd.f32 %v422_v24, %v119_v27  ;;  %v171_v29 = vpop.f32.mrf.mxu1 }
  0x9d   :  { %v172_v30 = vadd.f32 %v423_v25, %v171_v29 }
  0x9e   :  { %v347_v32 = vmul.f32 -1.442695, %v120_v28 }
  0x9f   :  { %v357_v33 = vmul.f32 -1.442695, %v172_v30 }
  0xa0   :  { %427 = vpow2.f32 %v347_v32 }
  0xa1   :  { %429 = vpow2.f32 %v357_v33 }
  0xa3   :  { %v121_v35 = vpop.f32.mrf.mxu0 }
  0xa4   :  { %v173_v37 = vpop.f32.mrf.mxu1  ;;  %v223_v38 = vpop.f32.mrf.mxu2 }
  0xa5   :  { %v224_v58 = vadd.f32 %v424_v52, %v223_v38 }
  0xa6   :  { %v428_v39 = vpop.eup %427 }
  0xa7   :  { %v430_v40 = vpop.eup %429  ;;  %v126_v41 = vadd.f32 1.0, %v428_v39 }
  0xa8   :  { %v178_v42 = vadd.f32 1.0, %v430_v40 }
  0xa9   :  { %431 = vrcp.f32 %v126_v41  ;;  %v138_v49 = vand.u32 2147483648, %v126_v41  ;;  %v136_v51 = vand.u32 2147483647, %v126_v41  ;;  %vm132_vm2 = vweird.f32 %v126_v41 }
  0xaa   :  { %433 = vrcp.f32 %v178_v42  ;;  %v190_v63 = vand.u32 2147483648, %v178_v42  ;;  %vm184_vm5 = vweird.f32 %v178_v42  ;;  %v188_v1 = vand.u32 2147483647, %v178_v42 }
  0xab   :  { %v139_v56 = vor.u32 1.1754944e-38, %v138_v49  ;;  %vm137_vm4 = vcmp.eq.f32.partialorder %v136_v51, 8.507059e+37 }
  0xac   :  { %v225_v43 = vpop.f32.mrf.mxu2  ;;  %v191_v2 = vor.u32 1.1754944e-38, %v190_v63  ;;  %vm189_vm8 = vcmp.eq.f32.partialorder %v188_v1, 8.507059e+37 }
  0xaf   :  { %v432_v44 = vpop.eup %431 }
  0xb0   :  { %v434_v45 = vpop.eup %433  ;;  %v128_v46 = vmul.f32 %v432_v44, %v126_v41  ;;  %vm133_vm1 = vweird.f32 %v432_v44 }
  0xb1   :  { %v180_v47 = vmul.f32 %v434_v45, %v178_v42  ;;  %vm134_vm3 = vmor %vm132_vm2, %vm133_vm1  ;;  %vm185_vm6 = vweird.f32 %v434_v45 }
  0xb2   :  { %v129_v48 = vsub.f32 1.0, %v128_v46  ;;  %vm186_vm7 = vmor %vm184_vm5, %vm185_vm6 }
  0xb3   :  { %v181_v53 = vsub.f32 1.0, %v180_v47 }
  0xb4   :  { %v130_v50 = vmul.f32 %v432_v44, %v129_v48 }
  0xb5   :  { %v182_v60 = vmul.f32 %v434_v45, %v181_v53 }
  0xb6   :  { %v131_v54 = vadd.f32 %v432_v44, %v130_v50 }
  0xb7   :  { %v183_v0 = vadd.f32 %v434_v45, %v182_v60 }
  0xb8   :  { %v135_v57 = vsel %vm134_vm3, %v432_v44, %v131_v54 }
  0xb9   :  { %v140_v59 = vsel %vm137_vm4, %v139_v56, %v135_v57  ;;  %v187_v3 = vsel %vm186_vm7, %v434_v45, %v183_v0 }
  0xba   :  { %v231_v61 = vmul.f32 %v425_v55, %v140_v59  ;;  %v192_v5 = vsel %vm189_vm8, %v191_v2, %v187_v3 }
  0xbc   :  { %v232_v62 = vadd.f32 %v231_v61, %v224_v58 }
  0xbe   :  { %435 = vtanh.f32 %v232_v62 }
  0xc4   :  { %v436_v4 = vpop.eup %435 }
  0xc5   :  { %v234_v6 = vmul.f32 %v436_v4, %v192_v5 }
  0xc7   :  { %v235_v7 = vpack.c.bf16 %v234_v6, %v234_v6 }
  0xc9   :  { %312 = vmatmul.bf16.vlgmr.msra.gmra.mxu3 %v235_v7 }
 0x14c   :  { %v313_v9 = vpop.f32.mrf.mxu3 }
 0x14d   :  { %v314_v10 = vadd.f32 %v426_v8, %v313_v9 }
 0x14f   :  { %v317_v11 = vpack.c.bf16 %v314_v10, %v314_v10 }
 0x151   :  { %318 = vst [vmem:[#allocation10] sm:$0xf] %v317_v11 }
 0x152   :  { %329 = dma.vmem_to_hbm [thread:$0]  %s325_s21, 64, %s327_s24, [#allocation4]  }
 0x154   :  { %v315_v12 = vpop.f32.mrf.mxu3 }
 0x155   :  { %563 = dma.done.wait [#allocation4], 64  }
 0x156   :  { %564 = vsyncadd [#allocation4], 4294967232 }
 0x157   :  { %334 = vsyncpa [#allocation3], 1 }
 0x158   :  { %335 = vsyncpa [#allocation6], 1 }
 0x159   :  { %336 = vsyncpa [#allocation9], 1 }
 0x15a   :  { %337 = vsyncpa [#allocation4], 1 }

</bundles_post_ra>
